<compile_context>
chip_gen: v7x
topology: tpu7x:2x2x1
jax: 0.10.0
libtpu: 0.0.40
codegen_flags: <defaults>
</compile_context>

<pallas_src>
import functools

import jax
import jax.numpy as jnp
import numpy as np
from jax import lax
from jax.experimental import pallas as pl
from jax.experimental.pallas import tpu as pltpu

MARGIN = 0.3


def _semi_hard_triplet_kernel(emb_i_ref, emb_j_ref, out_ref, e_ref, *, n, b, margin):
    # Assemble embeddings = cat(emb_i, emb_j) directly in VMEM scratch; cast to
    # f32 on-chip (matches the reference's precise_embeddings cast).
    e_ref[0:b, :] = emb_i_ref[...].astype(jnp.float32)
    e_ref[b:n, :] = emb_j_ref[...].astype(jnp.float32)
    e = e_ref[...]                                                     # (N, D) f32

    # --- squared pairwise distances, clamp at 0, zero diagonal ---------------
    sq = jnp.sum(e * e, axis=-1, keepdims=True)                        # (N, 1)
    gram = jnp.dot(e, e.T, preferred_element_type=jnp.float32)         # (N, N) MXU
    pdist = jnp.maximum(sq + sq.T - 2.0 * gram, 0.0)
    # (the reference's error_mask multiply is a no-op after the clamp)

    ii = lax.broadcasted_iota(jnp.int32, (n, n), 0)
    jj = lax.broadcasted_iota(jnp.int32, (n, n), 1)
    diag = ii == jj
    pdist = jnp.where(diag, 0.0, pdist)

    # labels = range(B)+range(B)  =>  label[i]==label[j]  iff  i==j or |i-j|==B
    pos_mask = jnp.abs(ii - jj) == b                  # adjacency minus diagonal
    adj_not = jnp.logical_not(jnp.logical_or(diag, pos_mask))

    # Exactly one positive per anchor row -> extract pdist[i, (i+B) mod N].
    pos = jnp.sum(jnp.where(pos_mask, pdist, 0.0), axis=1, keepdims=True)  # (N, 1)

    row_max = jnp.max(pdist, axis=1, keepdims=True)                    # (N, 1)
    row_min = jnp.min(pdist, axis=1, keepdims=True)                    # (N, 1)

    # negatives_inside: hardest (largest) negative distance per row.
    neg_in = (
        jnp.max(jnp.where(adj_not, pdist - row_min, 0.0), axis=1, keepdims=True)
        + row_min
    )

    # Semi-hard mining, single vectorized pass: negatives farther than the
    # positive; if any exist take the closest such, else the hardest negative.
    m = jnp.logical_and(adj_not, pdist > pos)                          # (N, N)
    has_semi = jnp.sum(m.astype(jnp.float32), axis=1, keepdims=True) > 0.0
    neg_out = (
        jnp.min(jnp.where(m, pdist - row_max, 0.0), axis=1, keepdims=True) + row_max
    )
    semi_hard = jnp.where(has_semi, neg_out, neg_in)                   # (N, 1)

    loss_vec = jnp.maximum(margin + pos - semi_hard, 0.0)              # (N, 1)
    # num_positives == N (one positive per anchor) -> compile-time constant.
    out_ref[0] = jnp.sum(loss_vec) / jnp.float32(n)


def semi_hard_triplet_loss(emb_i, emb_j, margin=MARGIN):
    """Pallas implementation of SemiHardTripletLoss.forward."""
    b, d = emb_i.shape
    n = 2 * b
    out = pl.pallas_call(
        functools.partial(_semi_hard_triplet_kernel, n=n, b=b, margin=margin),
        out_shape=jax.ShapeDtypeStruct((1,), jnp.float32),
        in_specs=[
            pl.BlockSpec(memory_space=pltpu.MemorySpace.VMEM),
            pl.BlockSpec(memory_space=pltpu.MemorySpace.VMEM),
        ],
        out_specs=pl.BlockSpec(memory_space=pltpu.MemorySpace.SMEM),
        scratch_shapes=[pltpu.VMEM((n, d), jnp.float32)],
    )(emb_i, emb_j)
    # Reference casts the loss back to the embeddings dtype.
    return out[0].astype(emb_i.dtype)


# ---------- pure-JAX reference (mirrors the torch code literally) ------------
def _ref_loss(emb_i, emb_j, margin=MARGIN):
    emb = jnp.concatenate([emb_i, emb_j], 0).astype(jnp.float32)
    B = emb_i.shape[0]
    N = 2 * B
    labels = jnp.concatenate([jnp.arange(B), jnp.arange(B)]).astype(jnp.float32)
    sq = jnp.sum(emb ** 2, -1)
    pd = sq[:, None] + sq[None, :] - 2.0 * emb @ emb.T
    pd = jnp.maximum(pd, 0.0)
    pd = pd * (pd > 0.0)
    pd = pd * (1.0 - jnp.eye(N))
    adjacency = labels[:, None] == labels[None, :]
    adj_not = ~adjacency
    pd_tile = jnp.tile(pd, (N, 1))
    adjn_tile = jnp.tile(adj_not, (N, 1))
    trans = pd.T.reshape(-1, 1)
    mask = adjn_tile & (pd_tile > trans)
    mask_f = mask.astype(jnp.float32)
    mask_final = (mask_f.sum(1) > 0.0).reshape(N, N).T
    axis_max = pd_tile.max(1, keepdims=True)
    masked_min = ((pd_tile - axis_max) * mask_f).min(1, keepdims=True) + axis_max
    neg_out = masked_min.reshape(N, N).T
    axis_min = pd.min(1, keepdims=True)
    masked_max = ((pd - axis_min) * adj_not.astype(jnp.float32)).max(
        1, keepdims=True
    ) + axis_min
    neg_in = jnp.tile(masked_max, (1, N))
    semi = jnp.where(mask_final, neg_out, neg_in)
    loss_mat = margin + pd - semi
    mask_pos = adjacency.astype(jnp.float32) - jnp.eye(N)
    return jnp.sum(jnp.maximum(loss_mat * mask_pos, 0.0)) / mask_pos.sum()


if __name__ == "__main__":
    key = jax.random.PRNGKey(0)
    k1, k2 = jax.random.split(key)
    B, D = 8, 32  # batch of 8 pairs, 32-dim embeddings -> N = 16
    emb_i = jax.random.normal(k1, (B, D), dtype=jnp.float32)
    emb_j = jax.random.normal(k2, (B, D), dtype=jnp.float32)

    loss = jax.block_until_ready(semi_hard_triplet_loss(emb_i, emb_j))
    ref = jax.block_until_ready(_ref_loss(emb_i, emb_j))
    np.testing.assert_allclose(np.asarray(loss), np.asarray(ref), rtol=1e-4, atol=1e-4)

    print("KERNEL_OK")
</pallas_src>

<mosaic_0001>
module attributes {stable_mosaic.version = 11 : i64} {
  func.func @_semi_hard_triplet_kernel(%arg0: memref<8x32xf32, #tpu.memory_space<vmem>>, %arg1: memref<8x32xf32, #tpu.memory_space<vmem>>, %arg2: memref<1xf32, #tpu.memory_space<smem>>, %arg3: memref<16x32xf32, #tpu.memory_space<vmem>>) attributes {dimension_semantics = [], scalar_prefetch = 0 : i64, scratch_operands = 1 : i64, tpu.core_type = #tpu.core_type<tc>} {
    %c0 = arith.constant 0 : index
    %c0_0 = arith.constant 0 : index
    %0 = vector.load %arg0[%c0, %c0_0] : memref<8x32xf32, #tpu.memory_space<vmem>>, vector<8x32xf32>
    %c0_1 = arith.constant 0 : index
    %c0_2 = arith.constant 0 : index
    %1 = vector.load %arg3[%c0_1, %c0_2] : memref<16x32xf32, #tpu.memory_space<vmem>>, vector<8x32xf32>
    tpu.vector_store %arg3[%c0_1, %c0_2], %0 {strides = array<i32>} : memref<16x32xf32, #tpu.memory_space<vmem>>, vector<8x32xf32>,
    %c0_3 = arith.constant 0 : index
    %c0_4 = arith.constant 0 : index
    %2 = vector.load %arg1[%c0_3, %c0_4] : memref<8x32xf32, #tpu.memory_space<vmem>>, vector<8x32xf32>
    %c8 = arith.constant 8 : index
    %c0_5 = arith.constant 0 : index
    %3 = vector.load %arg3[%c8, %c0_5] : memref<16x32xf32, #tpu.memory_space<vmem>>, vector<8x32xf32>
    tpu.vector_store %arg3[%c8, %c0_5], %2 {strides = array<i32>} : memref<16x32xf32, #tpu.memory_space<vmem>>, vector<8x32xf32>,
    %c0_6 = arith.constant 0 : index
    %c0_7 = arith.constant 0 : index
    %4 = vector.load %arg3[%c0_6, %c0_7] : memref<16x32xf32, #tpu.memory_space<vmem>>, vector<16x32xf32>
    %5 = arith.mulf %4, %4 : vector<16x32xf32>
    %cst = arith.constant dense<0.000000e+00> : vector<16xf32>
    %6 = vector.multi_reduction <add>, %5, %cst [1] : vector<16x32xf32> to vector<16xf32>
    %7 = vector.shape_cast %6 : vector<16xf32> to vector<16x1xf32>
    %8 = tpu.transpose %4, [1, 0] : vector<16x32xf32> -> vector<32x16xf32>
    %cst_8 = arith.constant dense<0.000000e+00> : vector<16x16xf32>
    %9 = tpu.matmul %4, %8, %cst_8 {dimension_numbers = #tpu.dot_dimension_numbers<[1], [0], [0], [1], [0, 0, 1, 1], [], []>} : vector<16x32xf32>, vector<32x16xf32>, vector<16x16xf32> -> vector<16x16xf32>
    %10 = tpu.transpose %7, [1, 0] : vector<16x1xf32> -> vector<1x16xf32>
    %11 = vector.broadcast %7 : vector<16x1xf32> to vector<16x16xf32>
    %12 = vector.broadcast %10 : vector<1x16xf32> to vector<16x16xf32>
    %13 = arith.addf %11, %12 : vector<16x16xf32>
    %cst_9 = arith.constant 2.000000e+00 : f32
    %14 = vector.broadcast %cst_9 : f32 to vector<16x16xf32>
    %15 = arith.mulf %14, %9 : vector<16x16xf32>
    %16 = arith.subf %13, %15 : vector<16x16xf32>
    %cst_10 = arith.constant 0.000000e+00 : f32
    %17 = vector.broadcast %cst_10 : f32 to vector<16x16xf32>
    %18 = arith.maximumf %16, %17 : vector<16x16xf32>
    %19 = tpu.iota {dimensions = array<i32: 0>} : vector<16x16xi32>
    %20 = tpu.iota {dimensions = array<i32: 1>} : vector<16x16xi32>
    %21 = arith.cmpi eq, %19, %20 : vector<16x16xi32>
    %cst_11 = arith.constant 0.000000e+00 : f32
    %22 = vector.broadcast %cst_11 : f32 to vector<16x16xf32>
    %23 = arith.select %21, %22, %18 : vector<16x16xi1>, vector<16x16xf32>
    %24 = arith.subi %19, %20 : vector<16x16xi32>
    %25 = math.absi %24 : vector<16x16xi32>
    %c8_i32 = arith.constant 8 : i32
    %26 = vector.broadcast %c8_i32 : i32 to vector<16x16xi32>
    %27 = arith.cmpi eq, %25, %26 : vector<16x16xi32>
    %28 = arith.ori %21, %27 : vector<16x16xi1>
    %cst_12 = arith.constant dense<true> : vector<16x16xi1>
    %29 = arith.xori %28, %cst_12 : vector<16x16xi1>
    %cst_13 = arith.constant 0.000000e+00 : f32
    %30 = vector.broadcast %cst_13 : f32 to vector<16x16xf32>
    %31 = arith.select %27, %23, %30 : vector<16x16xi1>, vector<16x16xf32>
    %cst_14 = arith.constant dense<0.000000e+00> : vector<16xf32>
    %32 = vector.multi_reduction <add>, %31, %cst_14 [1] : vector<16x16xf32> to vector<16xf32>
    %33 = vector.shape_cast %32 : vector<16xf32> to vector<16x1xf32>
    %cst_15 = arith.constant dense<0xFF800000> : vector<16xf32>
    %34 = vector.multi_reduction <maximumf>, %23, %cst_15 [1] : vector<16x16xf32> to vector<16xf32>
    %35 = vector.shape_cast %34 : vector<16xf32> to vector<16x1xf32>
    %cst_16 = arith.constant dense<0x7F800000> : vector<16xf32>
    %36 = vector.multi_reduction <minimumf>, %23, %cst_16 [1] : vector<16x16xf32> to vector<16xf32>
    %37 = vector.shape_cast %36 : vector<16xf32> to vector<16x1xf32>
    %38 = vector.broadcast %37 : vector<16x1xf32> to vector<16x16xf32>
    %39 = arith.subf %23, %38 : vector<16x16xf32>
    %cst_17 = arith.constant 0.000000e+00 : f32
    %40 = vector.broadcast %cst_17 : f32 to vector<16x16xf32>
    %41 = arith.select %29, %39, %40 : vector<16x16xi1>, vector<16x16xf32>
    %cst_18 = arith.constant dense<0xFF800000> : vector<16xf32>
    %42 = vector.multi_reduction <maximumf>, %41, %cst_18 [1] : vector<16x16xf32> to vector<16xf32>
    %43 = vector.shape_cast %42 : vector<16xf32> to vector<16x1xf32>
    %44 = arith.addf %43, %37 : vector<16x1xf32>
    %45 = vector.broadcast %33 : vector<16x1xf32> to vector<16x16xf32>
    %46 = arith.cmpf ogt, %23, %45 : vector<16x16xf32>
    %47 = arith.andi %29, %46 : vector<16x16xi1>
    %48 = arith.extui %47 : vector<16x16xi1> to vector<16x16xi32>
    %49 = arith.sitofp %48 : vector<16x16xi32> to vector<16x16xf32>
    %cst_19 = arith.constant dense<0.000000e+00> : vector<16xf32>
    %50 = vector.multi_reduction <add>, %49, %cst_19 [1] : vector<16x16xf32> to vector<16xf32>
    %51 = vector.shape_cast %50 : vector<16xf32> to vector<16x1xf32>
    %cst_20 = arith.constant 0.000000e+00 : f32
    %52 = vector.broadcast %cst_20 : f32 to vector<16x1xf32>
    %53 = arith.cmpf ogt, %51, %52 : vector<16x1xf32>
    %54 = vector.broadcast %35 : vector<16x1xf32> to vector<16x16xf32>
    %55 = arith.subf %23, %54 : vector<16x16xf32>
    %cst_21 = arith.constant 0.000000e+00 : f32
    %56 = vector.broadcast %cst_21 : f32 to vector<16x16xf32>
    %57 = arith.select %47, %55, %56 : vector<16x16xi1>, vector<16x16xf32>
    %cst_22 = arith.constant dense<0x7F800000> : vector<16xf32>
    %58 = vector.multi_reduction <minimumf>, %57, %cst_22 [1] : vector<16x16xf32> to vector<16xf32>
    %59 = vector.shape_cast %58 : vector<16xf32> to vector<16x1xf32>
    %60 = arith.addf %59, %35 : vector<16x1xf32>
    %61 = arith.select %53, %60, %44 : vector<16x1xi1>, vector<16x1xf32>
    %cst_23 = arith.constant 3.000000e-01 : f32
    %62 = vector.broadcast %cst_23 : f32 to vector<16x1xf32>
    %63 = arith.addf %62, %33 : vector<16x1xf32>
    %64 = arith.subf %63, %61 : vector<16x1xf32>
    %cst_24 = arith.constant 0.000000e+00 : f32
    %65 = vector.broadcast %cst_24 : f32 to vector<16x1xf32>
    %66 = arith.maximumf %64, %65 : vector<16x1xf32>
    %67 = vector.shape_cast %66 : vector<16x1xf32> to vector<1x16x1xf32>
    %cst_25 = arith.constant dense<0.000000e+00> : vector<1xf32>
    %68 = vector.multi_reduction <add>, %67, %cst_25 [1, 2] : vector<1x16x1xf32> to vector<1xf32>
    %69 = vector.shape_cast %68 : vector<1xf32> to vector<1x1x1xf32>
    %70 = vector.extract %69[0, 0, 0] : f32 from vector<1x1x1xf32>
    %cst_26 = arith.constant 1.600000e+01 : f32
    %71 = arith.divf %70, %cst_26 : f32
    %c0_27 = arith.constant 0 : index
    %72 = memref.load %arg2[%c0_27] : memref<1xf32, #tpu.memory_space<smem>>
    memref.store %71, %arg2[%c0_27] : memref<1xf32, #tpu.memory_space<smem>>
    return
  }
}

</mosaic_0001>

<bundles_post_ra>
// kernel: tpu_custom_call.1
= control target key start
LH: loop header
LB: loop body
LE: loop exit
PB: predicated region body
PF: predicated region fallthrough
CT: control target
= control target key end

     0   :  { %7 = vsyncpa [#allocation4], 0  ;;  %s499_s0 = inlined_call_operand.hbm [shape: f32[8,32], index: 0, kind: input, shape index: {}]   ;;  %s500_s1 = inlined_call_operand.hbm [shape: f32[8,32], index: 1, kind: input, shape index: {}]   ;;  %s501_s2 = inlined_call_operand.hbm [shape: f32[1], index: 2, kind: output, shape index: {}]  }
   0x1   :  { %8 = vsyncpa [#allocation7], 0 }
   0x2   :  { %9 = vsyncpa [#allocation5], 0  ;;  %s393_s9 = smov [#allocation3]   ;;  %s394_s11 = smov [#allocation6]  }
   0x3   :  { %s16_s10 = sshll.u32 %s393_s9, 4  ;;  %s26_s12 = sshll.u32 %s394_s11, 4  ;;  %s17_s10 = int_to_ptr.vmem [resolvable:$true] %s16_s10  ;;  %s27_s12 = int_to_ptr.vmem [resolvable:$true] %s26_s12 }
   0x4   :  { %s333_s15 = scalar_lea.hbm %s499_s0, 128 }
   0x5   :  { %p334_p0 = scmp.ne.s32.totalorder %s499_s0, %s333_s15  ;;  %p337_p1 = scmp.lt.u32.totalorder %s333_s15, %s499_s0 }
   0x7   :  { %p339_p2 = pnand %p337_p1, %p334_p0 }
   0x9   :  { %342 = shalt.err (!%p339_p2)
}
   0xa   :  { %s343_s20 = scalar_lea.vmem %s17_s10, 128  ;;  %p348_p4 = scmp.lt.s32.totalorder %s17_s10, %s17_s10 }
   0xb   :  { %p344_p3 = scmp.ne.s32.totalorder %s17_s10, %s343_s20  ;;  %p349_p5 = scmp.lt.s32.totalorder %s343_s20, %s343_s20 }
   0xd   :  { %p350_p6 = por %p349_p5, %p348_p4 }
   0xf   :  { %p351_p7 = pnand %p350_p6, %p344_p3 }
  0x11   :  { %354 = shalt.err (!%p351_p7)
}
  0x12   :  { %19 = dma.hbm_to_vmem [thread:$0]  %s499_s0, 128, %s17_s10, [#allocation4]  }
  0x13   :  { %s355_s25 = scalar_lea.hbm %s500_s1, 128 }
  0x14   :  { %p356_p8 = scmp.ne.s32.totalorder %s500_s1, %s355_s25  ;;  %p359_p9 = scmp.lt.u32.totalorder %s355_s25, %s500_s1 }
  0x16   :  { %p361_p10 = pnand %p359_p9, %p356_p8 }
  0x18   :  { %364 = shalt.err (!%p361_p10)
}
  0x19   :  { %s365_s30 = scalar_lea.vmem %s27_s12, 128  ;;  %p370_p12 = scmp.lt.s32.totalorder %s27_s12, %s27_s12 }
  0x1a   :  { %p366_p11 = scmp.ne.s32.totalorder %s27_s12, %s365_s30  ;;  %p371_p13 = scmp.lt.s32.totalorder %s365_s30, %s365_s30 }
  0x1c   :  { %p372_p0 = por %p371_p13, %p370_p12 }
  0x1e   :  { %p373_p1 = pnand %p372_p0, %p366_p11 }
  0x20   :  { %376 = shalt.err (!%p373_p1)
}
  0x21   :  { %29 = dma.hbm_to_vmem [thread:$0]  %s500_s1, 128, %s27_s12, [#allocation7]  }
  0x22   :  { %387 = dma.done.wait [#allocation4], 128  }
  0x23   :  { %388 = vsyncadd [#allocation4], 4294967168 }
  0x24   :  { %389 = dma.done.wait [#allocation7], 128  }
  0x25   :  { %390 = vsyncadd [#allocation7], 4294967168  ;;  %vm37_vm0 = vcmask 261120   ;;  %v36_v0 = vld [vmem:[#allocation3] sm:$0xff]  ;;  %v39_v1 = vld [vmem:[#allocation6] sm:$0xff]  ;;  %v164_v13 = vlaneseq  ;;  %vm201_vm3 = vcmask 130048  }
  0x26   :  { %38 = vst.msk [vmem:[#allocation2] sm:$0xff] %vm37_vm0, %v36_v0  ;;  %40 = vst.msk [vmem:[#allocation2 + $0x8] sm:$0xff] %vm37_vm0, %v39_v1  ;;  %vm395_vm9 = vmmov 1   ;;  %v396_v50 = vmov 0.0   ;;  %s377_s7 = scalar_lea.hbm %s501_s2, 16 }
  0x27   :  { %vm321_vm1 = vmpackc.low %vm37_vm0, %vm37_vm0  ;;  %v165_v14 = vshrl.u32 %v164_v13, 7  ;;  %v180_v16 = vand.u32 127, %v164_v13  ;;  %p378_p2 = scmp.ne.s32.totalorder %s501_s2, %s377_s7  ;;  %p381_p3 = scmp.lt.u32.totalorder %s377_s7, %s501_s2 }
  0x29   :  { %v178_v15 = vadd.s32 8, %v165_v14  ;;  %v166_v18 = vsub.s32 0, %v165_v14  ;;  %v185_v27 = vsub.s32 %v165_v14, %v180_v16  ;;  %vm181_vm5 = vcmp.eq.s32.totalorder %v165_v14, %v180_v16  ;;  %p383_p4 = pnand %p381_p3, %p378_p2 }
  0x2b   :  { %v186_v17 = vsub.s32 %v178_v15, %v180_v16  ;;  %vm182_vm2 = vcmp.eq.s32.totalorder %v178_v15, %v180_v16  ;;  %v188_v32 = vsub.s32 0, %v185_v27 }
  0x2d   :  { %v41_v2 = vld [vmem:[#allocation2] sm:$0xff]  ;;  %v42_v3 = vld [vmem:[#allocation2 + $0x8] sm:$0xff]  ;;  %v191_v19 = vsub.s32 0, %v186_v17  ;;  %v305_v38 = vmin.u32 %v188_v32, %v185_v27 }
  0x2e   :  { %v43_v4 = vmul.f32 %v41_v2, %v41_v2  ;;  %v44_v5 = vmul.f32 %v42_v3, %v42_v3  ;;  %v320_v6 = vpack.c.bf16 %v42_v3, %v41_v2  ;;  %317 = vmatprep.mubr.msk.f32.mxu0 %vm37_vm0, %v41_v2 }
  0x2f   :  { %v306_v26 = vmin.u32 %v191_v19, %v186_v17  ;;  %vm193_vm6 = vcmp.eq.s32.totalorder %v305_v38, 8 }
  0x30   :  { %v45_v7 = vsel %vm37_vm0, %v43_v4, 0.0  ;;  %322 = vmatprep.subr.msk.bf16.mxu0 %vm321_vm1, %v320_v6  ;;  %v48_v8 = vsel %vm37_vm0, %v44_v5, 0.0  ;;  %vm455_vm7 = vmor %vm181_vm5, %vm193_vm6 }
  0x31   :  { %46 = vadd.xlane.f32.xlu0 %v45_v7  ;;  %325 = vmatpush3.bf16.xpose.msk.msra.mxu0 %vm321_vm1, %v320_v6  ;;  %vm194_vm4 = vcmp.eq.s32.totalorder %v306_v26, 8  ;;  %vm197_vm13 = vmxor %vm455_vm7, %vm395_vm9 }
  0x32   :  { %vm196_vm8 = vmor %vm182_vm2, %vm194_vm4 }
  0x33   :  { %vm462_vm10 = vmxor %vm196_vm8, %vm395_vm9 }
  0x35   :  { %49 = vadd.xlane.f32.xlu0 %v48_v8 }
  0x38   :  { %318 = vmatmul.mubr.msk.f32.vlgmr.msra.gmra.mrb[0].mxu0 %vm37_vm0, %v42_v3 }
  0xbe   :  { %v47_v9 = vpop.xlane.xlu0 %46 }
  0xbf   :  { %132 = vxpose.xlu1.b32.start [1/2] (short) (narrow) %v47_v9, 8 }
  0xc2   :  { %v50_v10 = vpop.xlane.xlu0 %49 }
  0xc3   :  { %133 = vxpose.xlu1.b32.end [2/2] (short) (narrow) %v50_v10, 8 }
 0x10b   :  { %v319_v11 = vpop.f32.mrb[0].mxu0 }
 0x10c   :  { %v123_v12 = vpop.f32.mrb[1].mxu0  ;;  %v171_v22 = vmul.f32 2.0, %v319_v11 }
 0x10d   :  { %v170_v23 = vmul.f32 2.0, %v123_v12 }
 0x13f   :  { %v148_v20 = vpop.trf.xlu1 }
 0x140   :  { %v167_v21 = vrot.slane %v148_v20, %v166_v18 }
 0x142   :  { %v168_v24 = vadd.f32 %v167_v21, %v47_v9  ;;  %v169_v25 = vadd.f32 %v167_v21, %v50_v10 }
 0x144   :  { %v173_v28 = vsub.f32 %v169_v25, %v171_v22  ;;  %v172_v29 = vsub.f32 %v168_v24, %v170_v23 }
 0x146   :  { %v175_v30 = vmax.f32 %v173_v28, 0.0  ;;  %v174_v31 = vmax.f32 %v172_v29, 0.0 }
 0x148   :  { %v184_v33 = vsel %vm182_vm2, 0.0, %v175_v30  ;;  %v183_v36 = vsel %vm181_vm5, 0.0, %v174_v31  ;;  %vm268_vm2 = vcmask 7168  }
 0x149   :  { %v211_v34 = vsel %vm201_vm3, %v184_v33, -inf  ;;  %v200_v35 = vsel %vm194_vm4, %v184_v33, 0.0  ;;  %v208_v39 = vsel %vm201_vm3, %v183_v36, -inf  ;;  %v214_v40 = vsel %vm201_vm3, %v183_v36, inf }
 0x14a   :  { %212 = vmax.xlane.f32.xlu0 %v211_v34  ;;  %v205_v37 = vsel %vm201_vm3, %v200_v35, 0.0  ;;  %v199_v41 = vsel %vm193_vm6, %v183_v36, 0.0  ;;  %v217_v43 = vsel %vm201_vm3, %v184_v33, inf }
 0x14b   :  { %206 = vadd.xlane.f32.xlu1 %v205_v37  ;;  %v202_v42 = vsel %vm201_vm3, %v199_v41, 0.0 }
 0x14e   :  { %209 = vmax.xlane.f32.xlu0 %v208_v39 }
 0x152   :  { %215 = vmin.xlane.f32.xlu0 %v214_v40 }
 0x156   :  { %203 = vadd.xlane.f32.xlu0 %v202_v42 }
 0x15a   :  { %218 = vmin.xlane.f32.xlu0 %v217_v43 }
 0x1d7   :  { %v213_v45 = vpop.xlane.xlu0 %212 }
 0x1d8   :  { %v207_v47 = vpop.xlane.xlu1 %206  ;;  %v249_v60 = vsub.f32 %v184_v33, %v213_v45 }
 0x1d9   :  { %vm233_vm11 = vcmp.gt.f32.partialorder %v184_v33, %v207_v47  ;;  %v263_v14 = vadd.f32 0.3, %v207_v47 }
 0x1da   :  { %vm468_vm12 = vmand %vm462_vm10, %vm233_vm11 }
 0x1db   :  { %v210_v49 = vpop.xlane.xlu0 %209  ;;  %v308_v51 = vsel %vm468_vm12, 1.0, %v396_v50  ;;  %v251_v63 = vsel %vm468_vm12, %v249_v60, 0.0 }
 0x1dc   :  { %v243_v52 = vsel %vm201_vm3, %v308_v51, 0.0  ;;  %v248_v0 = vsub.f32 %v183_v36, %v210_v49  ;;  %v255_v1 = vsel %vm201_vm3, %v251_v63, inf }
 0x1dd   :  { %244 = vadd.xlane.f32.xlu1 %v243_v52 }
 0x1df   :  { %v216_v53 = vpop.xlane.xlu0 %215 }
 0x1e0   :  { %v220_v56 = vsub.f32 %v183_v36, %v216_v53 }
 0x1e2   :  { %v222_v61 = vsel %vm197_vm13, %v220_v56, 0.0 }
 0x1e3   :  { %v204_v54 = vpop.xlane.xlu0 %203  ;;  %v224_v62 = vsel %vm201_vm3, %v222_v61, -inf }
 0x1e4   :  { %vm232_vm14 = vcmp.gt.f32.partialorder %v183_v36, %v204_v54  ;;  %v262_v19 = vadd.f32 0.3, %v204_v54 }
 0x1e5   :  { %vm234_vm15 = vmand %vm197_vm13, %vm232_vm14 }
 0x1e6   :  { %v250_v2 = vsel %vm234_vm15, %v248_v0, 0.0  ;;  %v307_v4 = vsel %vm234_vm15, 1.0, %v396_v50 }
 0x1e7   :  { %v219_v55 = vpop.xlane.xlu0 %218  ;;  %v252_v3 = vsel %vm201_vm3, %v250_v2, inf  ;;  %v240_v5 = vsel %vm201_vm3, %v307_v4, 0.0 }
 0x1e8   :  { %v221_v57 = vsub.f32 %v184_v33, %v219_v55 }
 0x1ea   :  { %v223_v58 = vsel %vm462_vm10, %v221_v57, 0.0 }
 0x1eb   :  { %v227_v59 = vsel %vm201_vm3, %v223_v58, -inf }
 0x1ec   :  { %228 = vmax.xlane.f32.xlu0 %v227_v59 }
 0x1f0   :  { %225 = vmax.xlane.f32.xlu0 %v224_v62 }
 0x1f4   :  { %256 = vmin.xlane.f32.xlu0 %v255_v1 }
 0x1f8   :  { %253 = vmin.xlane.f32.xlu0 %v252_v3 }
 0x1fc   :  { %241 = vadd.xlane.f32.xlu0 %v240_v5 }
 0x26a   :  { %v245_v8 = vpop.xlane.xlu1 %244 }
 0x26b   :  { %vm247_vm0 = vcmp.gt.f32.partialorder %v245_v8, 0.0 }
 0x279   :  { %v229_v6 = vpop.xlane.xlu0 %228 }
 0x27a   :  { %v231_v11 = vadd.f32 %v229_v6, %v219_v55 }
 0x27d   :  { %v226_v7 = vpop.xlane.xlu0 %225 }
 0x27e   :  { %v230_v16 = vadd.f32 %v226_v7, %v216_v53 }
 0x281   :  { %v257_v9 = vpop.xlane.xlu0 %256 }
 0x282   :  { %v259_v10 = vadd.f32 %v257_v9, %v213_v45 }
 0x284   :  { %v261_v12 = vsel %vm247_vm0, %v259_v10, %v231_v11 }
 0x285   :  { %v254_v13 = vpop.xlane.xlu0 %253  ;;  %v265_v15 = vsub.f32 %v263_v14, %v261_v12 }
 0x286   :  { %v258_v17 = vadd.f32 %v254_v13, %v210_v49 }
 0x287   :  { %v267_v22 = vmax.f32 %v265_v15, 0.0 }
 0x289   :  { %v242_v18 = vpop.xlane.xlu0 %241  ;;  %v270_v25 = vsel %vm268_vm2, %v267_v22, 0.0 }
 0x28a   :  { %vm246_vm1 = vcmp.gt.f32.partialorder %v242_v18, 0.0 }
 0x28b   :  { %v260_v20 = vsel %vm246_vm1, %v258_v17, %v230_v16 }
 0x28c   :  { %v264_v21 = vsub.f32 %v262_v19, %v260_v20 }
 0x28e   :  { %v266_v23 = vmax.f32 %v264_v21, 0.0 }
 0x290   :  { %v269_v24 = vsel %vm268_vm2, %v266_v23, 0.0 }
 0x291   :  { %v271_v26 = vadd.f32 %v270_v25, %v269_v24 }
 0x293   :  { %272 = vadd.xlane.f32.xlu0 %v271_v26 }
 0x320   :  { %v273_v27 = vpop.xlane.xlu0 %272 }
 0x321   :  { %v274_v28 = vrot.slane %v273_v27, 4 }
 0x323   :  { %v275_v29 = vadd.f32 %v274_v28, %v273_v27 }
 0x325   :  { %v276_v30 = vrot.slane %v275_v29, 2 }
 0x327   :  { %v277_v31 = vadd.f32 %v276_v30, %v275_v29 }
 0x329   :  { %v278_v32 = vrot.slane %v277_v31, 1 }
 0x32b   :  { %v279_v33 = vadd.f32 %v278_v32, %v277_v31 }
 0x32d   :  { %326 = vpush %v279_v33 }
 0x35e   :  { %s327_s1 = spop %326 }
 0x35f   :  { %s283_s4 = smul.f32 0.0625, %s327_s1 }
 0x361   :  { %285 = sst [smem:[#allocation8]] %s283_s4 }
 0x362   :  { %386 = shalt.err (!%p383_p4)
}
 0x363   :  { %s397_s12 = smov [#allocation8]  }
 0x364   :  { %293 = dma.smem_to_hbm %s397_s12, 16, %s501_s2, [#allocation5]  }
 0x365   :  { %391 = dma.done.wait [#allocation5], 16  }
 0x366   :  { %392 = vsyncadd [#allocation5], 4294967280 }
 0x367   :  { %297 = sfence }
 0x368   :  { %298 = vsyncpa [#allocation4], 1 }
 0x369   :  { %299 = vsyncpa [#allocation7], 1 }
 0x36a   :  { %300 = vsyncpa [#allocation5], 1 }

</bundles_post_ra>
